<compile_context>
chip_gen: v6e
topology: v6e:2x2x1
jax: 0.10.0
libtpu: 0.0.40
codegen_flags: <defaults>
</compile_context>

<pallas_src>
import functools

import jax
import jax.numpy as jnp
from jax import lax
from jax.experimental import pallas as pl
from jax.experimental.pallas import tpu as pltpu


def _round_up(x, m):
    return (x + m - 1) // m * m


def _proj_norm_kernel(p_ref, w_ref, b_ref, g_ref, bt_ref, o_ref, *, true_dim, eps):
    # p_ref : (tm, K)   im2col patch rows (feature order cin, kh, kw)
    # w_ref : (K, Dp)   projection weight, lane-padded to Dp (pad cols are zero)
    # b_ref : (1, Dp)   effective conv bias (time channel folded), zero in pad lanes
    # g_ref : (1, Dp)   LayerNorm gamma, zero in pad lanes
    # bt_ref: (1, Dp)   LayerNorm beta,  zero in pad lanes
    # o_ref : (tm, Dp)
    y = jnp.dot(p_ref[...], w_ref[...], preferred_element_type=jnp.float32)
    y = y + b_ref[...].astype(jnp.float32)

    dp = y.shape[-1]
    inv_d = jnp.float32(1.0 / true_dim)
    # Pad lanes of y are exactly zero (zero weight columns + zero bias), so the
    # plain lane sum already equals the sum over the true `dim` channels.
    mean = jnp.sum(y, axis=-1, keepdims=True) * inv_d
    centered = y - mean
    if dp != true_dim:
        lane = lax.broadcasted_iota(jnp.int32, (1, dp), 1)
        centered_m = jnp.where(lane < true_dim, centered, 0.0)
    else:
        centered_m = centered
    var = jnp.sum(centered_m * centered_m, axis=-1, keepdims=True) * inv_d
    xn = centered * lax.rsqrt(var + jnp.float32(eps))
    out = xn * g_ref[...].astype(jnp.float32) + bt_ref[...].astype(jnp.float32)
    o_ref[...] = out.astype(o_ref.dtype)


def prepare_patch_embedding_params(weight, bias, gamma, beta, *,
                                   compute_dtype=jnp.float32):
    """One-time (per-parameter) prep: transpose/pad/cast the conv weight.

    weight: (dim, Cin+1, P, P)  PyTorch Conv2d layout; last in-channel is the
            synthetic constant time channel.
    bias, gamma, beta: (dim,)
    """
    dim, cin_p1, ph, pw = weight.shape
    cin = cin_p1 - 1
    k = cin * ph * pw
    dp = _round_up(dim, 128)

    # image part of the conv weight, flattened with feature order (cin, kh, kw)
    w_img = weight[:, :cin].reshape(dim, k)
    w_t = jnp.transpose(w_img, (1, 0))                               # (K, dim)
    w_pad = jnp.zeros((k, dp), compute_dtype).at[:, :dim].set(
        w_t.astype(compute_dtype))

    # Constant time channel folds into the bias (padding=0 conv):
    #   conv(cat([x, t*ones]))[d] = conv(x, W_img)[d] + t * sum_{kh,kw} W[d, -1, kh, kw] + b[d]
    w_time_sum = jnp.sum(weight[:, cin], axis=(-1, -2))              # (dim,)

    def pad_vec(v):
        return jnp.zeros((1, dp), jnp.float32).at[0, :dim].set(
            v.astype(jnp.float32))

    return dict(
        w_pad=w_pad,
        bias_pad=pad_vec(bias),
        wtime_pad=pad_vec(w_time_sum),
        gamma_pad=pad_vec(gamma),
        beta_pad=pad_vec(beta),
        dim=dim, cin=cin, patch=(ph, pw), dp=dp,
        compute_dtype=compute_dtype,
    )


def patch_embedding_forward(x, timestep, params, *, stride, tm=512, eps=1e-5):
    """x: (B, Cin, H, W). Returns (B, Ho*Wo, dim)."""
    B, Cin, H, W = x.shape
    assert Cin == params["cin"], (Cin, params["cin"])
    ph, pw = params["patch"]
    sh, sw = (stride, stride) if isinstance(stride, int) else stride
    Ho = (H - ph) // sh + 1
    Wo = (W - pw) // sw + 1
    dim, dp = params["dim"], params["dp"]
    K = Cin * ph * pw
    M = B * Ho * Wo

    # --- im2col patch gather (layout plumbing, plain XLA) ---
    cols = []
    for kh in range(ph):
        for kw in range(pw):
            cols.append(x[:, :,
                          kh: kh + sh * (Ho - 1) + 1: sh,
                          kw: kw + sw * (Wo - 1) + 1: sw])            # (B,Cin,Ho,Wo)
    patches = jnp.stack(cols, axis=-1)                                # (B,Cin,Ho,Wo,ph*pw)
    patches = patches.transpose(0, 2, 3, 1, 4).reshape(M, K)          # feature=(cin,kh,kw)
    patches = patches.astype(params["compute_dtype"])

    # --- row tiling: cdiv grid + zero row padding (no divisibility assert) ---
    tm_eff = min(_round_up(tm, 8), _round_up(M, 8))
    Mp = _round_up(M, tm_eff)
    if Mp != M:
        patches = jnp.pad(patches, ((0, Mp - M), (0, 0)))

    # per-call (cheap) part of param prep: fold the timestep into the bias
    t = jnp.asarray(timestep, jnp.float32)
    b_eff = params["bias_pad"] + t * params["wtime_pad"]              # (1, Dp)

    out = pl.pallas_call(
        functools.partial(_proj_norm_kernel, true_dim=dim, eps=eps),
        out_shape=jax.ShapeDtypeStruct((Mp, dp), jnp.float32),
        grid_spec=pltpu.PrefetchScalarGridSpec(
            num_scalar_prefetch=0,
            grid=(Mp // tm_eff,),
            in_specs=[
                pl.BlockSpec((tm_eff, K), lambda i: (i, 0)),
                pl.BlockSpec((K, dp), lambda i: (0, 0)),
                pl.BlockSpec((1, dp), lambda i: (0, 0)),
                pl.BlockSpec((1, dp), lambda i: (0, 0)),
                pl.BlockSpec((1, dp), lambda i: (0, 0)),
            ],
            out_specs=pl.BlockSpec((tm_eff, dp), lambda i: (i, 0)),
        ),
        compiler_params=pltpu.CompilerParams(
            dimension_semantics=("parallel",),
            vmem_limit_bytes=48 * 1024 * 1024,
        ),
    )(patches, params["w_pad"], b_eff,
      params["gamma_pad"], params["beta_pad"])

    return out[:M, :dim].reshape(B, Ho * Wo, dim)


def _reference(x, timestep, weight, bias, gamma, beta, *, stride, eps=1e-5):
    B, C, H, W = x.shape
    tch = jnp.full((B, 1, H, W), timestep, dtype=x.dtype)
    xc = jnp.concatenate([x, tch], axis=1)
    y = lax.conv_general_dilated(
        xc, weight, window_strides=(stride, stride), padding="VALID",
        dimension_numbers=("NCHW", "OIHW", "NCHW"))
    y = y + bias[None, :, None, None]
    B_, D, Ho, Wo = y.shape
    y = y.reshape(B_, D, Ho * Wo).transpose(0, 2, 1)                  # (B, L, dim)
    mean = jnp.mean(y, axis=-1, keepdims=True)
    var = jnp.mean((y - mean) ** 2, axis=-1, keepdims=True)
    return (y - mean) / jnp.sqrt(var + eps) * gamma + beta


if __name__ == "__main__":
    # Module config: dim=32, patch_size=4, stride=4, in_channels=1
    # Input: x (B=2, Cin=1, H=16, W=16), scalar timestep.
    B, Cin, H, W = 2, 1, 16, 16
    dim, P, S = 32, 4, 4
    timestep = 0.7

    key = jax.random.PRNGKey(0)
    kx, kw, kb, kg, kbt = jax.random.split(key, 5)

    x = jax.random.normal(kx, (B, Cin, H, W), dtype=jnp.float32)
    weight = jax.random.normal(kw, (dim, Cin + 1, P, P), dtype=jnp.float32) * 0.1
    bias = jax.random.normal(kb, (dim,), dtype=jnp.float32) * 0.1
    gamma = 1.0 + 0.1 * jax.random.normal(kg, (dim,), dtype=jnp.float32)
    beta = 0.1 * jax.random.normal(kbt, (dim,), dtype=jnp.float32)

    # For production use, swap compute_dtype to jnp.bfloat16 (bf16 MXU path);
    # f32 here so the toy check is tight.
    params = prepare_patch_embedding_params(weight, bias, gamma, beta,
                                            compute_dtype=jnp.float32)

    out = patch_embedding_forward(x, timestep, params, stride=S)
    out = jax.block_until_ready(out)

    ref = _reference(x, timestep, weight, bias, gamma, beta, stride=S)
    Ho, Wo = (H - P) // S + 1, (W - P) // S + 1
    assert out.shape == (B, Ho * Wo, dim), out.shape
    assert jnp.allclose(out, ref, atol=2e-4, rtol=2e-4), (
        float(jnp.max(jnp.abs(out - ref))))

    print("KERNEL_OK")
</pallas_src>

<mosaic_0001>
module attributes {stable_mosaic.version = 11 : i64} {
  func.func @_proj_norm_kernel(%arg0: i32, %arg1: memref<32x16xf32, #tpu.memory_space<vmem>>, %arg2: memref<16x128xf32, #tpu.memory_space<vmem>>, %arg3: memref<1x128xf32, #tpu.memory_space<vmem>>, %arg4: memref<1x128xf32, #tpu.memory_space<vmem>>, %arg5: memref<1x128xf32, #tpu.memory_space<vmem>>, %arg6: memref<32x128xf32, #tpu.memory_space<vmem>>) attributes {dimension_semantics = [#tpu.dimension_semantics<parallel>], iteration_bounds = array<i64: 1>, scalar_prefetch = 0 : i64, scratch_operands = 0 : i64, tpu.core_type = #tpu.core_type<tc>, window_params = [{transform_indices = @transform_0, window_bounds = array<i64: 32, 16>}, {pipeline_mode = #tpu.pipeline_mode<synchronous>, transform_indices = @transform_1, window_bounds = array<i64: 16, 128>}, {pipeline_mode = #tpu.pipeline_mode<synchronous>, transform_indices = @transform_2, window_bounds = array<i64: 1, 128>}, {pipeline_mode = #tpu.pipeline_mode<synchronous>, transform_indices = @transform_3, window_bounds = array<i64: 1, 128>}, {pipeline_mode = #tpu.pipeline_mode<synchronous>, transform_indices = @transform_4, window_bounds = array<i64: 1, 128>}, {transform_indices = @transform_5, window_bounds = array<i64: 32, 128>}]} {
    %c0 = arith.constant 0 : index
    %c0_0 = arith.constant 0 : index
    %0 = vector.load %arg1[%c0, %c0_0] : memref<32x16xf32, #tpu.memory_space<vmem>>, vector<32x16xf32>
    %c0_1 = arith.constant 0 : index
    %c0_2 = arith.constant 0 : index
    %1 = vector.load %arg2[%c0_1, %c0_2] : memref<16x128xf32, #tpu.memory_space<vmem>>, vector<16x128xf32>
    %cst = arith.constant dense<0.000000e+00> : vector<32x128xf32>
    %2 = tpu.matmul %0, %1, %cst {dimension_numbers = #tpu.dot_dimension_numbers<[1], [0], [0], [1], [0, 0, 1, 1], [], []>} : vector<32x16xf32>, vector<16x128xf32>, vector<32x128xf32> -> vector<32x128xf32>
    %c0_3 = arith.constant 0 : index
    %c0_4 = arith.constant 0 : index
    %3 = vector.load %arg3[%c0_3, %c0_4] : memref<1x128xf32, #tpu.memory_space<vmem>>, vector<1x128xf32>
    %4 = vector.broadcast %3 : vector<1x128xf32> to vector<32x128xf32>
    %5 = arith.addf %2, %4 : vector<32x128xf32>
    %cst_5 = arith.constant dense<0.000000e+00> : vector<32xf32>
    %6 = vector.multi_reduction <add>, %5, %cst_5 [1] : vector<32x128xf32> to vector<32xf32>
    %7 = vector.shape_cast %6 : vector<32xf32> to vector<32x1xf32>
    %cst_6 = arith.constant 3.125000e-02 : f32
    %8 = vector.broadcast %cst_6 : f32 to vector<32x1xf32>
    %9 = arith.mulf %7, %8 : vector<32x1xf32>
    %10 = vector.broadcast %9 : vector<32x1xf32> to vector<32x128xf32>
    %11 = arith.subf %5, %10 : vector<32x128xf32>
    %12 = tpu.iota {dimensions = array<i32: 1>} : vector<1x128xi32>
    %c32_i32 = arith.constant 32 : i32
    %13 = vector.broadcast %c32_i32 : i32 to vector<1x128xi32>
    %14 = arith.cmpi slt, %12, %13 : vector<1x128xi32>
    %cst_7 = arith.constant 0.000000e+00 : f32
    %15 = vector.shape_cast %14 : vector<1x128xi1> to vector<1x128xi1>
    %16 = vector.broadcast %15 : vector<1x128xi1> to vector<32x128xi1>
    %17 = vector.broadcast %cst_7 : f32 to vector<32x128xf32>
    %18 = arith.select %16, %11, %17 : vector<32x128xi1>, vector<32x128xf32>
    %19 = arith.mulf %18, %18 : vector<32x128xf32>
    %cst_8 = arith.constant dense<0.000000e+00> : vector<32xf32>
    %20 = vector.multi_reduction <add>, %19, %cst_8 [1] : vector<32x128xf32> to vector<32xf32>
    %21 = vector.shape_cast %20 : vector<32xf32> to vector<32x1xf32>
    %cst_9 = arith.constant 3.125000e-02 : f32
    %22 = vector.broadcast %cst_9 : f32 to vector<32x1xf32>
    %23 = arith.mulf %21, %22 : vector<32x1xf32>
    %cst_10 = arith.constant 9.99999974E-6 : f32
    %24 = vector.broadcast %cst_10 : f32 to vector<32x1xf32>
    %25 = arith.addf %23, %24 : vector<32x1xf32>
    %26 = math.rsqrt %25 : vector<32x1xf32>
    %27 = vector.broadcast %26 : vector<32x1xf32> to vector<32x128xf32>
    %28 = arith.mulf %11, %27 : vector<32x128xf32>
    %c0_11 = arith.constant 0 : index
    %c0_12 = arith.constant 0 : index
    %29 = vector.load %arg4[%c0_11, %c0_12] : memref<1x128xf32, #tpu.memory_space<vmem>>, vector<1x128xf32>
    %30 = vector.broadcast %29 : vector<1x128xf32> to vector<32x128xf32>
    %31 = arith.mulf %28, %30 : vector<32x128xf32>
    %c0_13 = arith.constant 0 : index
    %c0_14 = arith.constant 0 : index
    %32 = vector.load %arg5[%c0_13, %c0_14] : memref<1x128xf32, #tpu.memory_space<vmem>>, vector<1x128xf32>
    %33 = vector.broadcast %32 : vector<1x128xf32> to vector<32x128xf32>
    %34 = arith.addf %31, %33 : vector<32x128xf32>
    %c0_15 = arith.constant 0 : index
    %c0_16 = arith.constant 0 : index
    %35 = vector.load %arg6[%c0_15, %c0_16] : memref<32x128xf32, #tpu.memory_space<vmem>>, vector<32x128xf32>
    tpu.vector_store %arg6[%c0_15, %c0_16], %34 {strides = array<i32>} : memref<32x128xf32, #tpu.memory_space<vmem>>, vector<32x128xf32>,
    return
  }
  func.func @transform_0(%arg0: i32) -> (i32, i32) {
    %c0_i32 = arith.constant 0 : i32
    %c0_i32_0 = arith.constant 0 : i32
    return %arg0, %c0_i32 : i32, i32
  }
  func.func @transform_1(%arg0: i32) -> (i32, i32) {
    %c0_i32 = arith.constant 0 : i32
    %c0_i32_0 = arith.constant 0 : i32
    %c0_i32_1 = arith.constant 0 : i32
    return %c0_i32, %c0_i32_0 : i32, i32
  }
  func.func @transform_2(%arg0: i32) -> (i32, i32) {
    %c0_i32 = arith.constant 0 : i32
    %c0_i32_0 = arith.constant 0 : i32
    %c0_i32_1 = arith.constant 0 : i32
    return %c0_i32, %c0_i32_0 : i32, i32
  }
  func.func @transform_3(%arg0: i32) -> (i32, i32) {
    %c0_i32 = arith.constant 0 : i32
    %c0_i32_0 = arith.constant 0 : i32
    %c0_i32_1 = arith.constant 0 : i32
    return %c0_i32, %c0_i32_0 : i32, i32
  }
  func.func @transform_4(%arg0: i32) -> (i32, i32) {
    %c0_i32 = arith.constant 0 : i32
    %c0_i32_0 = arith.constant 0 : i32
    %c0_i32_1 = arith.constant 0 : i32
    return %c0_i32, %c0_i32_0 : i32, i32
  }
  func.func @transform_5(%arg0: i32) -> (i32, i32) {
    %c0_i32 = arith.constant 0 : i32
    %c0_i32_0 = arith.constant 0 : i32
    return %arg0, %c0_i32 : i32, i32
  }
}

</mosaic_0001>

<bundles_post_ra>
// kernel: tpu_custom_call.1
= control target key start
LH: loop header
LB: loop body
LE: loop exit
PB: predicated region body
PF: predicated region fallthrough
CT: control target
= control target key end

     0   :  { %vm34_vm0 = vcmask 130048   ;;  %s354_s0 = inlined_call_operand.vmem [shape: f32[32,16], index: 0, kind: input, shape index: {}]   ;;  %s355_s1 = inlined_call_operand.vmem [shape: f32[16,128], index: 1, kind: input, shape index: {}]   ;;  %s356_s2 = inlined_call_operand.vmem [shape: f32[1,128], index: 2, kind: input, shape index: {}]   ;;  %s357_s3 = inlined_call_operand.vmem [shape: f32[1,128], index: 3, kind: input, shape index: {}]   ;;  %s358_s4 = inlined_call_operand.vmem [shape: f32[1,128], index: 4, kind: input, shape index: {}]   ;;  %s359_s5 = inlined_call_operand.hbm [shape: f32[32,128], index: 5, kind: output, shape index: {}]  }
   0x1   :  { %v26_v0 = vld [vmem:[%s355_s1 + $0x8] sm:$0xff]  ;;  %v25_v1 = vld [vmem:[%s355_s1] sm:$0xff]  ;;  %v23_v3 = vld [vmem:[%s354_s0 + $0x10] sm:$0xff] }
   0x2   :  { %240 = vmatprep.subr.mxu0 %v26_v0  ;;  %250 = vmatprep.subr.mxu1 %v26_v0  ;;  %v21_v2 = vld [vmem:[%s354_s0] sm:$0xff] }
   0x3   :  { %241 = vmatpush3.msra.mxu0 %v26_v0  ;;  %252 = vmatpush3.msra.mxu1 %v26_v0 }
   0x4   :  { %10 = vsyncpa [#allocation3], 0  ;;  %242 = vmatprep.subr.mxu0 %v25_v1  ;;  %251 = vmatprep.subr.mxu1 %v25_v1  ;;  %v22_v4 = vld [vmem:[%s354_s0 + $0x8] sm:$0xff]  ;;  %v24_v5 = vld [vmem:[%s354_s0 + $0x18] sm:$0xff]  ;;  %v148_v15 = vlaneseq  ;;  %s287_s8 = smov [#allocation2]  }
   0x5   :  { %243 = vmatpush3.msra.mxu0 %v25_v1  ;;  %253 = vmatpush3.msra.mxu1 %v25_v1  ;;  %v227_v8 = vld [vmem:[%s356_s2] ss:$0 sm:$0xff] }
   0x6   :  { %244 = vmatprep.mubr.msk.f32.mxu0 %vm34_vm0, %v21_v2  ;;  %247 = vmatprep.mubr.msk.f32.mxu1 %vm34_vm0, %v23_v3  ;;  %v149_v16 = vand.u32 127, %v148_v15  ;;  %v232_v50 = vld [vmem:[%s357_s3] ss:$0 sm:$0xff]  ;;  %s216_s3 = sshll.u32 %s287_s8, 4  ;;  %s217_s3 = int_to_ptr.vmem [resolvable:$true] %s216_s3 }
   0x7   :  { %245 = vmatmul.mubr.msk.f32.vlgmr.msra.gmra.mxu0 %vm34_vm0, %v22_v4  ;;  %248 = vmatmul.mubr.msk.f32.vlgmr.msra.gmra.mxu1 %vm34_vm0, %v24_v5  ;;  %v233_v52 = vld [vmem:[%s358_s4] ss:$0 sm:$0xff]  ;;  %s265_s4 = scalar_lea.vmem %s217_s3, 512  ;;  %p270_p1 = scmp.lt.s32.totalorder %s217_s3, %s217_s3 }
   0x8   :  { %vm150_vm1 = vcmp.lt.s32.totalorder %v149_v16, 32  ;;  %p266_p0 = scmp.ne.s32.totalorder %s217_s3, %s265_s4  ;;  %p271_p2 = scmp.lt.s32.totalorder %s265_s4, %s265_s4 }
   0xa   :  { %p272_p3 = por %p271_p2, %p270_p1 }
   0xc   :  { %p273_p4 = pnand %p272_p3, %p266_p0 }
  0xc7   :  { %v246_v6 = vpop.f32.mrf.mxu0  ;;  %v249_v7 = vpop.f32.mrf.mxu1 }
  0xc8   :  { %v119_v13 = vadd.f32 %v246_v6, %v227_v8  ;;  %v129_v14 = vadd.f32 %v249_v7, %v227_v8 }
  0xc9   :  { %v113_v9 = vpop.f32.mrf.mxu0  ;;  %v123_v10 = vpop.f32.mrf.mxu1 }
  0xca   :  { %v114_v11 = vadd.f32 %v227_v8, %v113_v9  ;;  %v124_v12 = vadd.f32 %v227_v8, %v123_v10 }
  0xcc   :  { %136 = vadd.xlane.f32.xlu1 %v124_v12  ;;  %132 = vadd.xlane.f32.xlu0 %v114_v11 }
  0xd0   :  { %138 = vadd.xlane.f32.xlu1 %v129_v14  ;;  %134 = vadd.xlane.f32.xlu0 %v119_v13 }
 0x155   :  { %v137_v17 = vpop.xlane.xlu1 %136  ;;  %v133_v18 = vpop.xlane.xlu0 %132 }
 0x156   :  { %v142_v19 = vmul.f32 0.03125, %v137_v17  ;;  %v140_v20 = vmul.f32 0.03125, %v133_v18 }
 0x158   :  { %v146_v21 = vsub.f32 %v124_v12, %v142_v19  ;;  %v144_v22 = vsub.f32 %v114_v11, %v140_v20 }
 0x159   :  { %v139_v23 = vpop.xlane.xlu1 %138  ;;  %v135_v24 = vpop.xlane.xlu0 %134 }
 0x15a   :  { %v143_v25 = vmul.f32 0.03125, %v139_v23  ;;  %v141_v26 = vmul.f32 0.03125, %v135_v24  ;;  %v153_v27 = vsel %vm150_vm1, %v144_v22, 0.0  ;;  %v155_v31 = vsel %vm150_vm1, %v146_v21, 0.0 }
 0x15b   :  { %v157_v28 = vmul.f32 %v153_v27, %v153_v27  ;;  %v159_v33 = vmul.f32 %v155_v31, %v155_v31 }
 0x15c   :  { %v147_v29 = vsub.f32 %v129_v14, %v143_v25  ;;  %v145_v30 = vsub.f32 %v119_v13, %v141_v26 }
 0x15d   :  { %161 = vadd.xlane.f32.xlu0 %v157_v28 }
 0x15e   :  { %v154_v32 = vsel %vm150_vm1, %v145_v30, 0.0  ;;  %v156_v35 = vsel %vm150_vm1, %v147_v29, 0.0 }
 0x15f   :  { %v158_v34 = vmul.f32 %v154_v32, %v154_v32  ;;  %v160_v36 = vmul.f32 %v156_v35, %v156_v35 }
 0x161   :  { %165 = vadd.xlane.f32.xlu0 %v159_v33  ;;  %163 = vadd.xlane.f32.xlu1 %v158_v34 }
 0x165   :  { %167 = vadd.xlane.f32.xlu1 %v160_v36 }
 0x1e6   :  { %v162_v37 = vpop.xlane.xlu0 %161 }
 0x1e7   :  { %v169_v38 = vmul.f32 0.03125, %v162_v37 }
 0x1e9   :  { %v173_v39 = vadd.f32 1e-05, %v169_v38 }
 0x1ea   :  { %v164_v40 = vpop.xlane.xlu1 %163  ;;  %v166_v41 = vpop.xlane.xlu0 %165 }
 0x1eb   :  { %257 = vrsqrt.f32 %v173_v39  ;;  %v170_v42 = vmul.f32 0.03125, %v164_v40  ;;  %v171_v43 = vmul.f32 0.03125, %v166_v41 }
 0x1ed   :  { %v174_v44 = vadd.f32 1e-05, %v170_v42  ;;  %v175_v45 = vadd.f32 1e-05, %v171_v43 }
 0x1ee   :  { %v168_v46 = vpop.xlane.xlu1 %167 }
 0x1ef   :  { %259 = vrsqrt.f32 %v174_v44  ;;  %v172_v47 = vmul.f32 0.03125, %v168_v46 }
 0x1f0   :  { %261 = vrsqrt.f32 %v175_v45 }
 0x1f1   :  { %v176_v48 = vadd.f32 1e-05, %v172_v47 }
 0x1f3   :  { %263 = vrsqrt.f32 %v176_v48 }
 0x1f8   :  { %v258_v49 = vpop.eup %257 }
 0x1f9   :  { %v181_v51 = vmul.f32 %v258_v49, %v144_v22 }
 0x1fb   :  { %v192_v53 = vmul.f32 %v232_v50, %v181_v51 }
 0x1fc   :  { %v260_v54 = vpop.eup %259 }
 0x1fd   :  { %v262_v55 = vpop.eup %261  ;;  %v182_v56 = vmul.f32 %v260_v54, %v145_v30  ;;  %v203_v57 = vadd.f32 %v233_v52, %v192_v53 }
 0x1fe   :  { %v183_v58 = vmul.f32 %v262_v55, %v146_v21 }
 0x1ff   :  { %v193_v59 = vmul.f32 %v232_v50, %v182_v56  ;;  %207 = vst [vmem:[#allocation2] sm:$0xff] %v203_v57 }
 0x200   :  { %v264_v60 = vpop.eup %263  ;;  %v194_v61 = vmul.f32 %v232_v50, %v183_v58 }
 0x201   :  { %v184_v62 = vmul.f32 %v264_v60, %v147_v29  ;;  %v204_v63 = vadd.f32 %v233_v52, %v193_v59 }
 0x202   :  { %v205_v0 = vadd.f32 %v233_v52, %v194_v61 }
 0x203   :  { %v195_v1 = vmul.f32 %v232_v50, %v184_v62  ;;  %208 = vst [vmem:[#allocation2 + $0x8] sm:$0xff] %v204_v63 }
 0x204   :  { %209 = vst [vmem:[#allocation2 + $0x10] sm:$0xff] %v205_v0 }
 0x205   :  { %v206_v2 = vadd.f32 %v233_v52, %v195_v1 }
 0x207   :  { %210 = vst [vmem:[#allocation2 + $0x18] sm:$0xff] %v206_v2 }
 0x208   :  { %276 = shalt.err (!%p273_p4)
}
 0x209   :  { %s288_s9 = smov 128   ;;  %s289_s10 = smov 8  }
 0x20a   :  { %222 = dma.vmem_to_hbm [thread:$0]  %s217_s3, 512, %s359_s5, [#allocation3], %s288_s9, %s288_s9, %s289_s10  }
 0x20b   :  { %285 = dma.done.wait [#allocation3], 512  }
 0x20c   :  { %286 = vsyncadd [#allocation3], 4294966784 }
 0x20d   :  { %226 = vsyncpa [#allocation3], 1 }

</bundles_post_ra>
